<compile_context>
chip_gen: v5e
topology: v5e:2x2
jax: 0.10.0
libtpu: 0.0.40
codegen_flags: <defaults>
</compile_context>

<pallas_src>
import jax
import jax.numpy as jnp
from jax.experimental import pallas as pl
from jax.experimental.pallas import tpu as pltpu


def _round_up(n, m):
    return ((n + m - 1) // m) * m


def dqn_kernel(x_ref, w1_ref, b1_ref, w2r_ref, b2_ref, out_ref):
    # x tile: (TM, 64); everything below accumulates in f32 regardless of the
    # dtype x arrives in (bf16 x is promoted on the VMEM-resident tile).
    h = jnp.dot(x_ref[...], w1_ref[...],
                preferred_element_type=jnp.float32)        # (TM, 32), MXU
    h = jnp.maximum(h + b1_ref[...], 0.0)                  # bias + ReLU, f32 VPU
    # fc2 as VPU multiply + lane reduction (an N=1 matmul wastes the MXU and
    # pays MXU issue/result latency for nothing).
    o = jnp.sum(h * w2r_ref[...], axis=-1, keepdims=True)  # (TM, 1)
    out_ref[...] = (o + b2_ref[0, 0]).astype(out_ref.dtype)


def _choose_tile_m(B, tile_m, split_threshold):
    """Pick a legal batch tile: multiple of 8 (or the full batch), and >=2 grid
    steps for moderate/large batches so v7x's two TensorCores both get work."""
    tile_m = max(8, (int(tile_m) // 8) * 8)          # robust to odd tile_m
    if B > tile_m:
        return tile_m                                # grid_m >= 2 automatically
    if B >= split_threshold:
        return _round_up(pl.cdiv(B, 2), 8)           # force grid_m == 2
    return B                                         # full-batch block (always legal)


def dqn_forward(x, w1, b1, w2, b2, *, tile_m=8192, split_threshold=2048,
                x_buffers=2):
    """y = relu(x @ w1 + b1) @ w2 + b2, computed in batch tiles on TPU.

    Pass x in bf16 when it already lives in bf16 upstream to halve HBM traffic;
    no cast is performed here (a standalone wrapper-side cast would cost an
    extra full pass over the dominant operand).
    """
    B, F_in = x.shape          # F_in = 64
    H = w1.shape[1]            # 32
    assert w1.shape == (F_in, H) and w2.shape == (H, 1)

    # fc2 weights as a broadcastable (1, H) row; b2 as a (1, 1) SMEM scalar.
    w2_row = w2.reshape(1, H).astype(jnp.float32)
    b1 = b1.reshape(1, H).astype(jnp.float32)
    b2 = b2.reshape(1, 1).astype(jnp.float32)

    tm = _choose_tile_m(B, tile_m, split_threshold)
    grid_m = pl.cdiv(B, tm)    # partial final block allowed; OOB writes masked

    # x: streamed per batch tile; default double-buffered, optionally deeper.
    x_spec_kwargs = {}
    if x_buffers != 2:
        x_spec_kwargs["pipeline_mode"] = pl.Buffered(x_buffers)
    x_spec = pl.BlockSpec((tm, F_in), lambda i: (i, 0), **x_spec_kwargs)

    out = pl.pallas_call(
        dqn_kernel,
        out_shape=jax.ShapeDtypeStruct((B, 1), jnp.float32),
        grid=(grid_m,),
        in_specs=[
            x_spec,
            # Weights/bias: constant block index => VMEM-resident, no re-DMA.
            pl.BlockSpec((F_in, H), lambda i: (0, 0)),
            pl.BlockSpec((1, H), lambda i: (0, 0)),
            pl.BlockSpec((1, H), lambda i: (0, 0)),
            # b2: scalar in SMEM.
            pl.BlockSpec(memory_space=pltpu.MemorySpace.SMEM),
        ],
        out_specs=pl.BlockSpec((tm, 1), lambda i: (i, 0)),
        compiler_params=pltpu.CompilerParams(
            dimension_semantics=("parallel",)),
    )(x, w1, b1, w2_row, b2)

    return out


def init_params(key):
    # Deterministic init mimicking nn.Linear's U(-1/sqrt(fan_in), 1/sqrt(fan_in)).
    k1, k2, k3, k4 = jax.random.split(key, 4)
    lim1 = 1.0 / jnp.sqrt(64.0)
    lim2 = 1.0 / jnp.sqrt(32.0)
    w1 = jax.random.uniform(k1, (64, 32), jnp.float32, -lim1, lim1)
    b1 = jax.random.uniform(k2, (1, 32), jnp.float32, -lim1, lim1)
    w2 = jax.random.uniform(k3, (32, 1), jnp.float32, -lim2, lim2)
    b2 = jax.random.uniform(k4, (1, 1), jnp.float32, -lim2, lim2)
    return w1, b1, w2, b2


def _ref_forward(x, w1, b1, w2, b2):
    return jnp.maximum(x @ w1 + b1, 0.0) @ w2 + b2


if __name__ == "__main__":
    key = jax.random.PRNGKey(0)
    kx, kp, kx2, kx3 = jax.random.split(key, 4)
    w1, b1, w2, b2 = init_params(kp)

    # Small single-tile case (B=8), exact f32 semantics.
    B = 8
    x = jax.random.normal(kx, (B, 64), jnp.float32)
    out = jax.block_until_ready(dqn_forward(x, w1, b1, w2, b2))
    ref = _ref_forward(x, w1, b1, w2, b2)
    assert out.shape == (B, 1)
    assert jnp.allclose(out, ref, atol=1e-5, rtol=1e-5)

    # Ragged multi-tile case: 2 grid steps, partial final block, no jnp.pad.
    B2 = 1000
    x2 = jax.random.normal(kx2, (B2, 64), jnp.float32)
    out2 = jax.block_until_ready(dqn_forward(x2, w1, b1, w2, b2, tile_m=512))
    ref2 = _ref_forward(x2, w1, b1, w2, b2)
    assert out2.shape == (B2, 1)
    assert jnp.allclose(out2, ref2, atol=1e-5, rtol=1e-5)

    # Batch large enough to trigger the megacore split (grid_m == 2) under the
    # default large tile (tm = 1304 here), last block partial.
    B3 = 2600
    x3 = jax.random.normal(kx3, (B3, 64), jnp.float32)
    out3 = jax.block_until_ready(dqn_forward(x3, w1, b1, w2, b2))
    ref3 = _ref_forward(x3, w1, b1, w2, b2)
    assert out3.shape == (B3, 1)
    assert jnp.allclose(out3, ref3, atol=1e-5, rtol=1e-5)

    # bf16 activations arriving from upstream (no wrapper cast; w1 stays f32).
    x2_bf16 = x2.astype(jnp.bfloat16)
    out4 = jax.block_until_ready(dqn_forward(x2_bf16, w1, b1, w2, b2, tile_m=512))
    ref4 = _ref_forward(x2_bf16.astype(jnp.float32), w1, b1, w2, b2)
    assert jnp.allclose(out4, ref4, atol=1e-4, rtol=1e-4)

    print("KERNEL_OK")
</pallas_src>

<mosaic_0001>
module attributes {stable_mosaic.version = 11 : i64} {
  func.func @dqn_kernel(%arg0: i32, %arg1: memref<8x64xf32, #tpu.memory_space<vmem>>, %arg2: memref<64x32xf32, #tpu.memory_space<vmem>>, %arg3: memref<1x32xf32, #tpu.memory_space<vmem>>, %arg4: memref<1x32xf32, #tpu.memory_space<vmem>>, %arg5: memref<1x1xf32, #tpu.memory_space<smem>>, %arg6: memref<8x1xf32, #tpu.memory_space<vmem>>) attributes {dimension_semantics = [#tpu.dimension_semantics<parallel>], iteration_bounds = array<i64: 1>, scalar_prefetch = 0 : i64, scratch_operands = 0 : i64, tpu.core_type = #tpu.core_type<tc>, window_params = [{transform_indices = @transform_0, window_bounds = array<i64: 8, 64>}, {pipeline_mode = #tpu.pipeline_mode<synchronous>, transform_indices = @transform_1, window_bounds = array<i64: 64, 32>}, {pipeline_mode = #tpu.pipeline_mode<synchronous>, transform_indices = @transform_2, window_bounds = array<i64: 1, 32>}, {pipeline_mode = #tpu.pipeline_mode<synchronous>, transform_indices = @transform_3, window_bounds = array<i64: 1, 32>}, {transform_indices = @transform_4, window_bounds = array<i64: 1, 1>}, {transform_indices = @transform_5, window_bounds = array<i64: 8, 1>}]} {
    %c0 = arith.constant 0 : index
    %c0_0 = arith.constant 0 : index
    %0 = vector.load %arg1[%c0, %c0_0] : memref<8x64xf32, #tpu.memory_space<vmem>>, vector<8x64xf32>
    %c0_1 = arith.constant 0 : index
    %c0_2 = arith.constant 0 : index
    %1 = vector.load %arg2[%c0_1, %c0_2] : memref<64x32xf32, #tpu.memory_space<vmem>>, vector<64x32xf32>
    %cst = arith.constant dense<0.000000e+00> : vector<8x32xf32>
    %2 = tpu.matmul %0, %1, %cst {dimension_numbers = #tpu.dot_dimension_numbers<[1], [0], [0], [1], [0, 0, 1, 1], [], []>} : vector<8x64xf32>, vector<64x32xf32>, vector<8x32xf32> -> vector<8x32xf32>
    %c0_3 = arith.constant 0 : index
    %c0_4 = arith.constant 0 : index
    %3 = vector.load %arg3[%c0_3, %c0_4] : memref<1x32xf32, #tpu.memory_space<vmem>>, vector<1x32xf32>
    %4 = vector.broadcast %3 : vector<1x32xf32> to vector<8x32xf32>
    %5 = arith.addf %2, %4 : vector<8x32xf32>
    %cst_5 = arith.constant 0.000000e+00 : f32
    %6 = vector.broadcast %cst_5 : f32 to vector<8x32xf32>
    %7 = arith.maximumf %5, %6 : vector<8x32xf32>
    %c0_6 = arith.constant 0 : index
    %c0_7 = arith.constant 0 : index
    %8 = vector.load %arg4[%c0_6, %c0_7] : memref<1x32xf32, #tpu.memory_space<vmem>>, vector<1x32xf32>
    %9 = vector.broadcast %8 : vector<1x32xf32> to vector<8x32xf32>
    %10 = arith.mulf %7, %9 : vector<8x32xf32>
    %cst_8 = arith.constant dense<0.000000e+00> : vector<8xf32>
    %11 = vector.multi_reduction <add>, %10, %cst_8 [1] : vector<8x32xf32> to vector<8xf32>
    %12 = vector.shape_cast %11 : vector<8xf32> to vector<8x1xf32>
    %c0_9 = arith.constant 0 : index
    %c0_10 = arith.constant 0 : index
    %13 = memref.load %arg5[%c0_9, %c0_10] : memref<1x1xf32, #tpu.memory_space<smem>>
    %14 = vector.broadcast %13 : f32 to vector<8x1xf32>
    %15 = arith.addf %12, %14 : vector<8x1xf32>
    %c0_11 = arith.constant 0 : index
    %c0_12 = arith.constant 0 : index
    %16 = vector.load %arg6[%c0_11, %c0_12] : memref<8x1xf32, #tpu.memory_space<vmem>>, vector<8x1xf32>
    tpu.vector_store %arg6[%c0_11, %c0_12], %15 {strides = array<i32>} : memref<8x1xf32, #tpu.memory_space<vmem>>, vector<8x1xf32>,
    return
  }
  func.func @transform_0(%arg0: i32) -> (i32, i32) {
    %c0_i32 = arith.constant 0 : i32
    %c0_i32_0 = arith.constant 0 : i32
    return %arg0, %c0_i32 : i32, i32
  }
  func.func @transform_1(%arg0: i32) -> (i32, i32) {
    %c0_i32 = arith.constant 0 : i32
    %c0_i32_0 = arith.constant 0 : i32
    %c0_i32_1 = arith.constant 0 : i32
    return %c0_i32, %c0_i32_0 : i32, i32
  }
  func.func @transform_2(%arg0: i32) -> (i32, i32) {
    %c0_i32 = arith.constant 0 : i32
    %c0_i32_0 = arith.constant 0 : i32
    %c0_i32_1 = arith.constant 0 : i32
    return %c0_i32, %c0_i32_0 : i32, i32
  }
  func.func @transform_3(%arg0: i32) -> (i32, i32) {
    %c0_i32 = arith.constant 0 : i32
    %c0_i32_0 = arith.constant 0 : i32
    %c0_i32_1 = arith.constant 0 : i32
    return %c0_i32, %c0_i32_0 : i32, i32
  }
  func.func @transform_4(%arg0: i32) -> (i32, i32) {
    %c0_i32 = arith.constant 0 : i32
    %c0_i32_0 = arith.constant 0 : i32
    %c0_i32_1 = arith.constant 0 : i32
    return %c0_i32, %c0_i32_0 : i32, i32
  }
  func.func @transform_5(%arg0: i32) -> (i32, i32) {
    %c0_i32 = arith.constant 0 : i32
    %c0_i32_0 = arith.constant 0 : i32
    return %arg0, %c0_i32 : i32, i32
  }
}

</mosaic_0001>

<bundles_post_ra>
// kernel: tpu_custom_call.1
= control target key start
LH: loop header
LB: loop body
LE: loop exit
PB: predicated region body
PF: predicated region fallthrough
CT: control target
= control target key end

     0   :  { %vm34_vm0 = vcmask 523264   ;;  %vm64_vm1 = vcmask 261120   ;;  %vm71_vm2 = vcmask 7168   ;;  %s149_s1 = inlined_call_operand.vmem [shape: f32[64,32], index: 1, kind: input, shape index: {}]   ;;  %s150_s2 = inlined_call_operand.vmem [shape: f32[1,32], index: 2, kind: input, shape index: {}]   ;;  %s151_s0 = inlined_call_operand.vmem [shape: f32[8,64], index: 0, kind: input, shape index: {}]   ;;  %s152_s3 = inlined_call_operand.vmem [shape: f32[1,32], index: 3, kind: input, shape index: {}]   ;;  %s153_s4 = inlined_call_operand.<no memory space> [shape: f32[1,1], index: 4, kind: input, shape index: {}]   ;;  %s154_s5 = inlined_call_operand.vmem [shape: f32[8,1], index: 5, kind: output, shape index: {}]  }
   0x1   :  { %v29_v0 = vld [vmem:[%s149_s1 + $0x38] sm:$0xff]  ;;  %v28_v1 = vld [vmem:[%s149_s1 + $0x30] sm:$0xff]  ;;  %v27_v2 = vld [vmem:[%s149_s1 + $0x28] sm:$0xff]  ;;  %v69_v16 = vstv %s153_s4 }
   0x2   :  { %46 = vmatpush.msra.mxu0 %v29_v0  ;;  %v26_v3 = vld [vmem:[%s149_s1 + $0x20] sm:$0xff]  ;;  %v25_v4 = vld [vmem:[%s149_s1 + $0x18] sm:$0xff]  ;;  %v24_v5 = vld [vmem:[%s149_s1 + $0x10] sm:$0xff] }
   0x3   :  { %v23_v6 = vld [vmem:[%s149_s1 + $0x8] sm:$0xff]  ;;  %v22_v7 = vld [vmem:[%s149_s1] sm:$0xff] }
   0x4   :  { %47 = vmatpush.msra.mxu0 %v28_v1  ;;  %v21_v8 = vld [vmem:[%s151_s0] sm:$0xff] }
   0x5   :  { %v78_v9 = vld [vmem:[%s150_s2] ss:$0 sm:$0xff] }
   0x6   :  { %48 = vmatpush.msra.mxu0 %v27_v2  ;;  %v79_v12 = vld [vmem:[%s152_s3] ss:$0 sm:$0xff] }
   0x8   :  { %49 = vmatpush.msra.mxu0 %v26_v3 }
   0xa   :  { %50 = vmatpush.msra.mxu0 %v25_v4 }
   0xc   :  { %51 = vmatpush.msra.mxu0 %v24_v5 }
   0xe   :  { %52 = vmatpush.msra.mxu0 %v23_v6 }
  0x10   :  { %53 = vmatpush.msra.mxu0 %v22_v7 }
  0x11   :  { %77 = vmatmul.msk.f32.vlgmr.msra.gmra.mxu0 %vm34_vm0, %v21_v8 }
  0x8e   :  { %v55_v10 = vpop.f32.mrf.mxu0 }
  0x8f   :  { %v56_v11 = vadd.f32 %v78_v9, %v55_v10 }
  0x91   :  { %v58_v13 = vmax.f32 %v56_v11, 0.0 }
  0x93   :  { %v63_v14 = vmul.f32 %v79_v12, %v58_v13 }
  0x95   :  { %v65_v15 = vsel %vm64_vm1, %v63_v14, 0.0 }
  0x96   :  { %66 = vadd.xlane.f32.xlu0 %v65_v15 }
 0x109   :  { %v67_v17 = vpop.xlane.xlu0 %66 }
 0x10a   :  { %v70_v18 = vadd.f32 %v69_v16, %v67_v17 }
 0x10c   :  { %72 = vst.msk [vmem:[%s154_s5] sm:$0xff] %vm71_vm2, %v70_v18 }

</bundles_post_ra>
